<compile_context>
chip_gen: v7x
topology: tpu7x:2x2x1
jax: 0.10.0
libtpu: 0.0.40
codegen_flags: <defaults>
</compile_context>

<pallas_src>
import functools

import jax
import jax.numpy as jnp
from jax.experimental import pallas as pl
from jax.experimental.pallas import tpu as pltpu


_TILE_CANDIDATES = (32768, 16384, 8192, 4096, 2048, 1024, 512, 256, 128)
_SMALL_INPUT_BYTES = 512 * 1024  # below this, plain jnp.mean wins on launch overhead


def _round_up(n, m):
    return ((n + m - 1) // m) * m


def _vmem_caps():
    """(working-set budget, vmem_limit_bytes) derived from the chip's VMEM."""
    cap = 64 * 1024 * 1024  # conservative default (v7x per-TC VMEM)
    try:
        info = pltpu.get_tpu_info()
        cap = int(getattr(info, "vmem_capacity_bytes", cap)) or cap
    except Exception:  # pragma: no cover - defensive; fall back to v7x sizing
        pass
    # ~1/3 of physical VMEM for the double-buffered blocks, generous headroom
    # in the scoped limit (explicitly raised above the 16/32 MiB defaults).
    budget = min(40 * 1024 * 1024, cap // 3)
    limit = min((cap * 3) // 4, budget + 16 * 1024 * 1024)
    return budget, limit


def _choose_tile_n(n, rows, in_itemsize, out_itemsize, budget):
    """Largest 128-multiple lane tile whose (rows, tile) block fits the budget."""
    n_pad = _round_up(n, 128)
    for cand in _TILE_CANDIDATES:
        if cand > n_pad:
            continue
        vmem = 2 * rows * cand * in_itemsize + 2 * cand * out_itemsize
        if vmem <= budget:
            return cand
    return None  # even a 128-lane full-batch block is too big -> chunk B


def _choose_chunked(n, b, in_itemsize, out_itemsize, budget):
    """(tile_n, rows_per_block) for the grid-over-B fallback."""
    n_pad = _round_up(n, 128)
    for cand in _TILE_CANDIDATES:
        if cand > n_pad:
            continue
        fixed = 2 * cand * out_itemsize + 4 * cand  # out double-buffer + f32 scratch
        avail = budget - fixed
        if avail <= 0:
            continue
        tb = (avail // (2 * cand * in_itemsize)) // 8 * 8
        if tb >= 8:
            return cand, int(min(tb, _round_up(b, 8)))
    return 128, 8  # minimal legal block as a last resort


def _mean_dim0_kernel(x_ref, o_ref, *, inv_b):
    """Single-pass mean over the batch axis of one lane-dense tile.

    x_ref: (B, TILE_N) input block (all batches, one spatial tile)
    o_ref: (1, TILE_N) output block
    """
    s = jnp.sum(x_ref[...], axis=0, keepdims=True, dtype=jnp.float32)
    o_ref[...] = (s * inv_b).astype(o_ref.dtype)


def _mean_dim0_chunked_kernel(x_ref, o_ref, acc_ref, *, inv_b, b_total, tb,
                              need_mask):
    """Grid-over-B fallback: accumulate batch chunks into an f32 scratch.

    Grid = (spatial tiles [parallel], B chunks [arbitrary, innermost]).
    x_ref: (tb, TILE_N) input block, o_ref: (1, TILE_N), acc_ref: (1, TILE_N) f32.
    """
    k = pl.program_id(1)
    nk = pl.num_programs(1)

    @pl.when(k == 0)
    def _():
        acc_ref[...] = jnp.zeros_like(acc_ref)

    x = x_ref[...]
    if need_mask:
        # Zero out rows past the true batch extent in the ragged last chunk.
        row = jax.lax.broadcasted_iota(jnp.int32, x.shape, 0) + k * tb
        x = jnp.where(row < b_total, x, jnp.zeros_like(x))
    acc_ref[...] += jnp.sum(x, axis=0, keepdims=True, dtype=jnp.float32)

    @pl.when(k == nk - 1)
    def _():
        o_ref[...] = (acc_ref[...] * inv_b).astype(o_ref.dtype)


def tail_forward(x, *, force_pallas=False, b_block=None):
    """Tail.forward: mean over dim 0 of an NCHW (or any N-D) tensor."""
    B = x.shape[0]
    tail_shape = x.shape[1:]
    N = 1
    for d in tail_shape:
        N *= d

    itemsize = jnp.dtype(x.dtype).itemsize

    # Tiny inputs: fixed pallas_call launch/pipeline overhead dwarfs the work.
    if not force_pallas and b_block is None and B * N * itemsize < _SMALL_INPUT_BYTES:
        return jnp.mean(x, axis=0)

    x2 = x.reshape(B, N)  # lane-dense layout; no padding copy in HBM.
    budget, vmem_limit = _vmem_caps()
    cost = pl.CostEstimate(flops=B * N, transcendentals=0,
                           bytes_accessed=(B * N + N) * itemsize)

    tile_n = None if b_block is not None else _choose_tile_n(
        N, B, itemsize, itemsize, budget)

    if b_block is None and tile_n is not None:
        # Single pass: whole batch resident in one (B, tile_n) block.
        kernel = functools.partial(_mean_dim0_kernel, inv_b=1.0 / B)
        out2 = pl.pallas_call(
            kernel,
            out_shape=jax.ShapeDtypeStruct((1, N), x.dtype),
            grid_spec=pltpu.PrefetchScalarGridSpec(
                num_scalar_prefetch=0,
                grid=(pl.cdiv(N, tile_n),),
                in_specs=[pl.BlockSpec((B, tile_n), lambda j: (0, j))],
                out_specs=pl.BlockSpec((1, tile_n), lambda j: (0, j)),
            ),
            compiler_params=pltpu.CompilerParams(
                dimension_semantics=("parallel",),
                vmem_limit_bytes=int(vmem_limit),
            ),
            cost_estimate=cost,
        )(x2)
    else:
        # Grid-over-B fallback (very large B, or explicitly requested).
        if b_block is not None:
            tb = int(b_block)
            if tb != B and tb % 8 != 0:
                tb = _round_up(tb, 8)  # satisfy the (8, 128) block rule
            tile_n_c = _choose_tile_n(N, tb, itemsize, itemsize, budget) or 128
        else:
            tile_n_c, tb = _choose_chunked(N, B, itemsize, itemsize, budget)
        need_mask = (B % tb) != 0
        kernel = functools.partial(
            _mean_dim0_chunked_kernel,
            inv_b=1.0 / B, b_total=B, tb=tb, need_mask=need_mask)
        out2 = pl.pallas_call(
            kernel,
            out_shape=jax.ShapeDtypeStruct((1, N), x.dtype),
            grid_spec=pltpu.PrefetchScalarGridSpec(
                num_scalar_prefetch=0,
                grid=(pl.cdiv(N, tile_n_c), pl.cdiv(B, tb)),
                in_specs=[pl.BlockSpec((tb, tile_n_c), lambda j, k: (k, j))],
                out_specs=pl.BlockSpec((1, tile_n_c), lambda j, k: (0, j)),
                scratch_shapes=[pltpu.VMEM((1, tile_n_c), jnp.float32)],
            ),
            compiler_params=pltpu.CompilerParams(
                dimension_semantics=("parallel", "arbitrary"),
                vmem_limit_bytes=int(vmem_limit),
            ),
            cost_estimate=cost,
        )(x2)

    return out2[0].reshape(tail_shape)


if __name__ == "__main__":
    key = jax.random.PRNGKey(0)
    k1, k2, k3 = jax.random.split(key, 3)

    # 1) Module-sized NCHW input, forced through the Pallas single-pass path.
    x_small = jax.random.normal(k1, (2, 4, 16, 16), dtype=jnp.float32)
    out_small = jax.block_until_ready(tail_forward(x_small, force_pallas=True))
    ref_small = jnp.mean(x_small, axis=0)
    assert out_small.shape == ref_small.shape, (out_small.shape, ref_small.shape)
    assert jnp.allclose(out_small, ref_small, atol=1e-6, rtol=1e-6), float(
        jnp.max(jnp.abs(out_small - ref_small)))

    # Auto dispatch (tiny input -> jnp.mean bypass) stays correct.
    out_auto = jax.block_until_ready(tail_forward(x_small))
    assert jnp.allclose(out_auto, ref_small, atol=1e-6, rtol=1e-6)

    # 2) Non-128-multiple feature extent exercises the ragged last-tile path
    #    (no wrapper-side padding copy).
    x_ragged = jax.random.normal(k2, (4, 3, 10, 7), dtype=jnp.float32)  # N = 210
    out_r = jax.block_until_ready(tail_forward(x_ragged, force_pallas=True))
    ref_r = jnp.mean(x_ragged, axis=0)
    assert jnp.allclose(out_r, ref_r, atol=1e-6, rtol=1e-6), float(
        jnp.max(jnp.abs(out_r - ref_r)))

    # 3) Grid-over-B fallback with a ragged batch chunk (20 rows = 2*8 + 4).
    x_chunk = jax.random.normal(k3, (20, 4, 16, 16), dtype=jnp.float32)
    out_c = jax.block_until_ready(
        tail_forward(x_chunk, force_pallas=True, b_block=8))
    ref_c = jnp.mean(x_chunk, axis=0)
    assert jnp.allclose(out_c, ref_c, atol=1e-5, rtol=1e-5), float(
        jnp.max(jnp.abs(out_c - ref_c)))

    print("KERNEL_OK")
</pallas_src>

<mosaic_0001>
module attributes {stable_mosaic.version = 11 : i64} {
  func.func @_mean_dim0_kernel(%arg0: i32, %arg1: memref<2x1024xf32, #tpu.memory_space<vmem>>, %arg2: memref<1x1024xf32, #tpu.memory_space<vmem>>) attributes {dimension_semantics = [#tpu.dimension_semantics<parallel>], iteration_bounds = array<i64: 1>, scalar_prefetch = 0 : i64, scratch_operands = 0 : i64, tpu.core_type = #tpu.core_type<tc>, window_params = [{transform_indices = @transform_0, window_bounds = array<i64: 2, 1024>}, {transform_indices = @transform_1, window_bounds = array<i64: 1, 1024>}]} {
    %c0 = arith.constant 0 : index
    %c0_0 = arith.constant 0 : index
    %0 = vector.load %arg1[%c0, %c0_0] : memref<2x1024xf32, #tpu.memory_space<vmem>>, vector<2x1024xf32>
    %cst = arith.constant dense<0.000000e+00> : vector<1024xf32>
    %1 = vector.multi_reduction <add>, %0, %cst [0] : vector<2x1024xf32> to vector<1024xf32>
    %2 = vector.shape_cast %1 : vector<1024xf32> to vector<1x1024xf32>
    %cst_1 = arith.constant 5.000000e-01 : f32
    %3 = vector.broadcast %cst_1 : f32 to vector<1x1024xf32>
    %4 = arith.mulf %2, %3 : vector<1x1024xf32>
    %c0_2 = arith.constant 0 : index
    %c0_3 = arith.constant 0 : index
    %5 = vector.load %arg2[%c0_2, %c0_3] : memref<1x1024xf32, #tpu.memory_space<vmem>>, vector<1x1024xf32>
    tpu.vector_store %arg2[%c0_2, %c0_3], %4 {strides = array<i32>} : memref<1x1024xf32, #tpu.memory_space<vmem>>, vector<1x1024xf32>,
    return
  }
  func.func @transform_0(%arg0: i32) -> (i32, i32) {
    %c0_i32 = arith.constant 0 : i32
    %c0_i32_0 = arith.constant 0 : i32
    return %c0_i32, %arg0 : i32, i32
  }
  func.func @transform_1(%arg0: i32) -> (i32, i32) {
    %c0_i32 = arith.constant 0 : i32
    %c0_i32_0 = arith.constant 0 : i32
    return %c0_i32, %arg0 : i32, i32
  }
}

</mosaic_0001>

<bundles_post_ra>
// kernel: tpu_custom_call.1
= control target key start
LH: loop header
LB: loop body
LE: loop exit
PB: predicated region body
PF: predicated region fallthrough
CT: control target
= control target key end

     0   :  { %6 = vsyncpa [#allocation3], 0  ;;  %s314_s0 = inlined_call_operand.hbm [shape: f32[2,1024], index: 0, kind: input, shape index: {}]   ;;  %s315_s1 = inlined_call_operand.hbm [shape: f32[1,1024], index: 1, kind: output, shape index: {}]  }
   0x1   :  { %7 = vsyncpa [#allocation4], 0  ;;  %s260_s6 = smov [#allocation2]   ;;  %s212_s10 = scalar_lea.hbm %s314_s0, 256 }
   0x2   :  { %s14_s7 = sshll.u32 %s260_s6, 4  ;;  %p213_p0 = scmp.ne.s32.totalorder %s314_s0, %s212_s10  ;;  %s15_s7 = int_to_ptr.vmem [resolvable:$true] %s14_s7 }
   0x3   :  { %p216_p1 = scmp.lt.u32.totalorder %s212_s10, %s314_s0 }
   0x5   :  { %p218_p2 = pnand %p216_p1, %p213_p0 }
   0x7   :  { %221 = shalt.err (!%p218_p2)
}
   0x8   :  { %s222_s15 = scalar_lea.vmem %s15_s7, 256  ;;  %p227_p4 = scmp.lt.s32.totalorder %s15_s7, %s15_s7 }
   0x9   :  { %p223_p3 = scmp.ne.s32.totalorder %s15_s7, %s222_s15  ;;  %p228_p5 = scmp.lt.s32.totalorder %s222_s15, %s222_s15 }
   0xb   :  { %p229_p6 = por %p228_p5, %p227_p4 }
   0xd   :  { %p230_p7 = pnand %p229_p6, %p223_p3 }
   0xf   :  { %233 = shalt.err (!%p230_p7)
}
  0x10   :  { %17 = dma.hbm_to_vmem [thread:$0]  %s314_s0, 256, %s15_s7, [#allocation3]  }
  0x11   :  { %256 = dma.done.wait [#allocation3], 256  }
  0x12   :  { %257 = vsyncadd [#allocation3], 4294967040  ;;  %v29_v0 = vlaneseq  ;;  %v261_v1 = vmov 1983009808   ;;  %v262_v5 = vmov 1966171168  }
  0x13   :  { %v27_v2 = vunpack.c.l.s4 %v261_v1  ;;  %v145_v6 = vunpack.c.l.s4 %v262_v5  ;;  %v21_v8 = vld [vmem:[#allocation2] sm:$0xff]  ;;  %v22_v9 = vld [vmem:[#allocation2 + $0x8] sm:$0xff]  ;;  %vm67_vm0 = vcmask 1041408   ;;  %s263_s0 = smov [#allocation5]  }
  0x14   :  { %v30_v3 = vshrl.u32 %v29_v0, 7  ;;  %v25_v11 = vcombine.high %v21_v8, %v21_v8  ;;  %v42_v13 = vcombine.high %v22_v9, %v22_v9  ;;  %s197_s18 = sshll.u32 %s263_s0, 4  ;;  %s198_s18 = int_to_ptr.vmem [resolvable:$true] %s197_s18 }
  0x15   :  { %v28_v4 = vunpack.c.0.s8 %v27_v2  ;;  %v146_v10 = vunpack.c.0.s8 %v145_v6  ;;  %s234_s19 = scalar_lea.vmem %s198_s18, 128  ;;  %p239_p9 = scmp.lt.s32.totalorder %s198_s18, %s198_s18 }
  0x16   :  { %p235_p8 = scmp.ne.s32.totalorder %s198_s18, %s234_s19  ;;  %p240_p10 = scmp.lt.s32.totalorder %s234_s19, %s234_s19 }
  0x17   :  { %v31_v7 = vsub.s32 %v28_v4, %v30_v3  ;;  %v288_v21 = vsub.s32 %v146_v10, %v30_v3 }
  0x18   :  { %p241_p11 = por %p240_p10, %p239_p9 }
  0x19   :  { %v32_v12 = vrot.slane %v21_v8, %v31_v7  ;;  %v49_v14 = vrot.slane %v22_v9, %v31_v7  ;;  %v39_v15 = vrot.slane %v25_v11, %v31_v7  ;;  %v56_v17 = vrot.slane %v42_v13, %v31_v7 }
  0x1a   :  { %p242_p12 = pnand %p241_p11, %p235_p8 }
  0x1b   :  { %v40_v16 = vcombine.high %v32_v12, %v32_v12  ;;  %v57_v18 = vcombine.high %v49_v14, %v49_v14  ;;  %v68_v19 = vsel %vm67_vm0, %v32_v12, 0.0  ;;  %v96_v20 = vsel %vm67_vm0, %v49_v14, 0.0 }
  0x1c   :  { %v41_v22 = vcombine.high %v39_v15, %v39_v15  ;;  %v58_v23 = vcombine.high %v56_v17, %v56_v17  ;;  %v69_v24 = vrot.slane %v68_v19, 4  ;;  %v82_v27 = vsel %vm67_vm0, %v39_v15, 0.0 }
  0x1d   :  { %v75_v25 = vsel %vm67_vm0, %v40_v16, 0.0  ;;  %v97_v28 = vrot.slane %v96_v20, 4  ;;  %v103_v29 = vsel %vm67_vm0, %v57_v18, 0.0  ;;  %v83_v31 = vrot.slane %v82_v27, 4 }
  0x1e   :  { %v76_v26 = vrot.slane %v75_v25, 4  ;;  %v70_v30 = vadd.f32 %v69_v24, %v68_v19  ;;  %v89_v32 = vsel %vm67_vm0, %v41_v22, 0.0  ;;  %v104_v33 = vrot.slane %v103_v29, 4 }
  0x1f   :  { %v90_v35 = vrot.slane %v89_v32, 4  ;;  %v98_v36 = vadd.f32 %v97_v28, %v96_v20  ;;  %v110_v37 = vsel %vm67_vm0, %v56_v17, 0.0  ;;  %v84_v39 = vadd.f32 %v83_v31, %v82_v27 }
  0x20   :  { %v77_v34 = vadd.f32 %v76_v26, %v75_v25  ;;  %v71_v38 = vrot.slane %v70_v30, 2  ;;  %v105_v40 = vadd.f32 %v104_v33, %v103_v29  ;;  %v111_v41 = vrot.slane %v110_v37, 4 }
  0x21   :  { %v91_v43 = vadd.f32 %v90_v35, %v89_v32  ;;  %v99_v44 = vrot.slane %v98_v36, 2  ;;  %v117_v45 = vsel %vm67_vm0, %v58_v23, 0.0  ;;  %v85_v47 = vrot.slane %v84_v39, 2 }
  0x22   :  { %v78_v42 = vrot.slane %v77_v34, 2  ;;  %v72_v46 = vadd.f32 %v71_v38, %v70_v30  ;;  %v106_v48 = vrot.slane %v105_v40, 2  ;;  %v112_v49 = vadd.f32 %v111_v41, %v110_v37 }
  0x23   :  { %v92_v51 = vrot.slane %v91_v43, 2  ;;  %v100_v52 = vadd.f32 %v99_v44, %v98_v36  ;;  %v118_v53 = vrot.slane %v117_v45, 4  ;;  %v86_v55 = vadd.f32 %v85_v47, %v84_v39 }
  0x24   :  { %v79_v50 = vadd.f32 %v78_v42, %v77_v34  ;;  %v73_v54 = vrot.slane %v72_v46, 1  ;;  %v107_v56 = vadd.f32 %v106_v48, %v105_v40  ;;  %v113_v57 = vrot.slane %v112_v49, 2 }
  0x25   :  { %v93_v59 = vadd.f32 %v92_v51, %v91_v43  ;;  %v101_v60 = vrot.slane %v100_v52, 1  ;;  %v119_v61 = vadd.f32 %v118_v53, %v117_v45  ;;  %v87_v63 = vrot.slane %v86_v55, 1 }
  0x26   :  { %v80_v58 = vrot.slane %v79_v50, 1  ;;  %v74_v62 = vadd.f32 %v73_v54, %v72_v46  ;;  %v108_v0 = vrot.slane %v107_v56, 1  ;;  %v114_v1 = vadd.f32 %v113_v57, %v112_v49 }
  0x27   :  { %v94_v3 = vrot.slane %v93_v59, 1  ;;  %v102_v4 = vadd.f32 %v101_v60, %v100_v52  ;;  %v120_v5 = vrot.slane %v119_v61, 2  ;;  %v88_v6 = vadd.f32 %v87_v63, %v86_v55 }
  0x28   :  { %v81_v2 = vadd.f32 %v80_v58, %v79_v50  ;;  %v109_v7 = vadd.f32 %v108_v0, %v107_v56  ;;  %v115_v8 = vrot.slane %v114_v1, 1  ;;  %v124_v9 = vmul.f32 0.5, %v74_v62 }
  0x29   :  { %v95_v10 = vadd.f32 %v94_v3, %v93_v59  ;;  %v121_v11 = vadd.f32 %v120_v5, %v119_v61  ;;  %v128_v13 = vmul.f32 0.5, %v102_v4  ;;  %v126_v15 = vmul.f32 0.5, %v88_v6 }
  0x2a   :  { %v125_v12 = vmul.f32 0.5, %v81_v2  ;;  %v116_v14 = vadd.f32 %v115_v8, %v114_v1  ;;  %v129_v16 = vmul.f32 0.5, %v109_v7 }
  0x2b   :  { %v122_v17 = vrot.slane %v121_v11, 1  ;;  %v127_v18 = vmul.f32 0.5, %v95_v10 }
  0x2c   :  { %v140_v19 = vcombine.low %v124_v9, %v125_v12  ;;  %v130_v20 = vmul.f32 0.5, %v116_v14  ;;  %v142_v24 = vcombine.low %v128_v13, %v129_v16 }
  0x2d   :  { %v123_v22 = vadd.f32 %v122_v17, %v121_v11  ;;  %v141_v23 = vcombine.low %v126_v15, %v127_v18 }
  0x2e   :  { %v150_v25 = vrot.slane %v140_v19, %v288_v21  ;;  %v164_v29 = vrot.slane %v142_v24, %v288_v21 }
  0x2f   :  { %v131_v26 = vmul.f32 0.5, %v123_v22  ;;  %v157_v27 = vrot.slane %v141_v23, %v288_v21 }
  0x31   :  { %v143_v28 = vcombine.low %v130_v20, %v131_v26  ;;  %v172_v30 = vcombine.low %v150_v25, %v157_v27 }
  0x33   :  { %v171_v31 = vrot.slane %v143_v28, %v288_v21  ;;  %v180_v33 = vrot.slane %v172_v30, %v288_v21 }
  0x35   :  { %v173_v32 = vcombine.low %v164_v29, %v171_v31 }
  0x37   :  { %v187_v34 = vrot.slane %v173_v32, %v288_v21 }
  0x39   :  { %v188_v35 = vcombine.low %v180_v33, %v187_v34 }
  0x3b   :  { %190 = vst [vmem:[#allocation5] sm:$0xff] %v188_v35 }
  0x3c   :  { %245 = shalt.err (!%p242_p12)
}
  0x3d   :  { %s246_s22 = scalar_lea.hbm %s315_s1, 128 }
  0x3e   :  { %p247_p13 = scmp.ne.s32.totalorder %s315_s1, %s246_s22  ;;  %p250_p0 = scmp.lt.u32.totalorder %s246_s22, %s315_s1 }
  0x40   :  { %p252_p1 = pnand %p250_p0, %p247_p13 }
  0x42   :  { %255 = shalt.err (!%p252_p1)
}
  0x43   :  { %200 = dma.vmem_to_hbm [thread:$0]  %s198_s18, 128, %s315_s1, [#allocation4]  }
  0x44   :  { %258 = dma.done.wait [#allocation4], 128  }
  0x45   :  { %259 = vsyncadd [#allocation4], 4294967168 }
  0x46   :  { %204 = vsyncpa [#allocation3], 1 }
  0x47   :  { %205 = vsyncpa [#allocation4], 1 }

</bundles_post_ra>
